<compile_context>
chip_gen: v7x
topology: tpu7x:2x2x1
jax: 0.10.0
libtpu: 0.0.40
codegen_flags: <defaults>
</compile_context>

<pallas_src>
import functools

import jax
import jax.numpy as jnp
from jax.experimental import pallas as pl
from jax.experimental.pallas import tpu as pltpu

EPS = 1e-5          # InstanceNorm2d default eps
NEG_SLOPE = 0.2     # LeakyReLU negative slope
_VPU_CIN_MAX = 32   # at/below this contraction depth, skip the MXU round-trip
                    # (v5e could lower this to ~16; kept uniform for simplicity)


def _transpose_conv_block_kernel(x_ref, w_ref, o_ref):
    # x_ref: (nb, Cin, HW) bf16    w_ref: (4*Cout, Cin) f32    o_ref: (nb, 4*Cout, HW) bf16
    nb, cin, hw = x_ref.shape
    kc = w_ref.shape[0]
    cout = kc // 4

    wf = w_ref[...]  # (kc, cin) f32, tiny

    # ---- transpose conv: y3[n, k*Cout+co, s] = sum_ci x[n, ci, s] * w[k*Cout+co, ci]
    if cin <= _VPU_CIN_MAX:
        # Unrolled VPU broadcast-FMAs; one bf16 channel row upcast per step (no full f32
        # copy of x), weight column stays on sublanes (no relayout).
        y3 = None
        for ci in range(cin):
            xc = x_ref[:, ci:ci + 1, :].astype(jnp.float32)   # (nb, 1, hw)
            wc = wf[:, ci:ci + 1].reshape(1, kc, 1)            # (1, kc, 1)
            term = xc * wc                                     # -> (nb, kc, hw) f32
            y3 = term if y3 is None else y3 + term
    else:
        # MXU path for deep contractions: per-sample (kc, cin) @ (cin, hw), f32 accum.
        wb = wf.astype(jnp.bfloat16)
        ys = []
        for n in range(nb):  # nb is small and static
            ys.append(jnp.dot(wb, x_ref[n], preferred_element_type=jnp.float32))
        y3 = jnp.stack(ys, axis=0)                              # (nb, kc, hw) f32

    # ---- InstanceNorm2d stats (per sample, per output channel), single pass.
    # Lane reductions with keepdims keep stats on sublanes (no cross-layout move).
    s1 = jnp.sum(y3, axis=2, keepdims=True)          # (nb, kc, 1)
    s2 = jnp.sum(y3 * y3, axis=2, keepdims=True)     # (nb, kc, 1)
    # Fold the 4 kernel-position row groups (row = k*Cout + co) into per-channel sums.
    s1c = (s1[:, 0:cout] + s1[:, cout:2 * cout]
           + s1[:, 2 * cout:3 * cout] + s1[:, 3 * cout:4 * cout])   # (nb, cout, 1)
    s2c = (s2[:, 0:cout] + s2[:, cout:2 * cout]
           + s2[:, 2 * cout:3 * cout] + s2[:, 3 * cout:4 * cout])
    inv_count = 1.0 / (4.0 * hw)
    mean = s1c * inv_count                                          # (nb, cout, 1)
    var = jnp.maximum(s2c * inv_count - mean * mean, 0.0)           # biased var, clamped
    inv = jax.lax.rsqrt(var + EPS)

    # ---- normalize + LeakyReLU(0.2); lane-dense bf16 stores, one per kernel position.
    # TODO(synk): for very large H*W add an "arbitrary" spatial grid axis with
    # scratch-accumulated s1/s2 and a second normalization pass over the output tiles.
    for k in range(4):
        yk = (y3[:, k * cout:(k + 1) * cout, :] - mean) * inv
        o_ref[:, k * cout:(k + 1) * cout, :] = jnp.where(
            yk >= 0, yk, NEG_SLOPE * yk).astype(o_ref.dtype)


def _pad_to(v, m):
    return ((v + m - 1) // m) * m


def _tpu_vmem_capacity_bytes():
    try:
        return int(pltpu.get_tpu_info().vmem_capacity_bytes)
    except Exception:
        return 128 << 20  # v5e/v6e default if query unavailable


def _pick_batch_tile(n, bytes_per_sample, budget_bytes, max_nb):
    """Largest divisor of n (<= max_nb) whose per-step footprint fits the budget."""
    nb = 1
    for d in range(1, n + 1):
        if n % d == 0 and d <= max_nb and d * bytes_per_sample <= budget_bytes:
            nb = d
    return nb


def transpose_conv_block(x_nchw, weight):
    """x_nchw: (N, Cin, H, W); weight: (Cin, Cout, 2, 2) (PyTorch ConvTranspose2d layout).
    Returns (N, Cout, 2H, 2W) float32."""
    N, Cin, H, W = x_nchw.shape
    Cout = weight.shape[1]
    HW = H * W
    KC = 4 * Cout

    # Layout glue (no transpose of x): NCHW -> (N, Cin, HW) is a free reshape; bf16 feed.
    x = x_nchw.reshape(N, Cin, HW).astype(jnp.bfloat16)
    # Weight (Cin, Cout, kh, kw) -> (KC, Cin) with row r = (kh*2 + kw)*Cout + co; keep f32.
    w = jnp.transpose(weight, (2, 3, 1, 0)).reshape(KC, Cin).astype(jnp.float32)

    # ---- generation-aware VMEM budgeting (padded tile sizes + in-kernel f32 temps).
    vmem_cap = _tpu_vmem_capacity_bytes()
    small_vmem = vmem_cap <= (64 << 20)                  # v7x-like (64 MiB / TensorCore)
    budget_bytes = (6 << 20) if small_vmem else (24 << 20)
    limit_cap = (48 << 20) if small_vmem else (96 << 20)
    min_grid = 2 if small_vmem else 1                    # keep both v7x TCs busy

    hw_p = _pad_to(HW, 128)
    in_b = _pad_to(Cin, 16) * hw_p * 2                   # bf16 input tile / sample
    out_b = _pad_to(KC, 16) * hw_p * 2                   # bf16 output tile / sample
    f32_tmp = 3 * _pad_to(KC, 8) * hw_p * 4              # y3, y3*y3, yn live f32 temps
    bytes_per_sample = 2 * (in_b + out_b) + f32_tmp      # double-buffered I/O + temps

    max_nb = max(1, N // min_grid)
    nb = _pick_batch_tile(N, bytes_per_sample, budget_bytes, max_nb)
    grid = (N // nb,)

    w_bytes = 2 * _pad_to(KC, 8) * _pad_to(Cin, 128) * 4
    vmem_need = nb * bytes_per_sample + w_bytes
    vmem_limit = int(min(max(int(1.5 * vmem_need) + (4 << 20), 32 << 20), limit_cap))

    cost = pl.CostEstimate(
        flops=int(2.0 * N * HW * Cin * KC + 10.0 * N * KC * HW),
        transcendentals=int(N * Cout),
        bytes_accessed=int(x.size * 2 + w.size * 4 + N * KC * HW * 2),
    )

    out = pl.pallas_call(
        _transpose_conv_block_kernel,
        out_shape=jax.ShapeDtypeStruct((N, KC, HW), jnp.bfloat16),
        grid_spec=pltpu.PrefetchScalarGridSpec(
            num_scalar_prefetch=0,
            grid=grid,
            in_specs=[
                pl.BlockSpec((nb, Cin, HW), lambda b: (b, 0, 0)),
                pl.BlockSpec((KC, Cin), lambda b: (0, 0)),
            ],
            out_specs=pl.BlockSpec((nb, KC, HW), lambda b: (b, 0, 0)),
        ),
        compiler_params=pltpu.CompilerParams(
            dimension_semantics=("parallel",),   # batch tiles shard across v7x's 2 TCs
            vmem_limit_bytes=vmem_limit,
        ),
        cost_estimate=cost,
    )(x, w)

    # Glue: (N, 4*Cout, HW) with row (kh*2+kw)*Cout+co  ->  (N, Cout, 2H, 2W).
    out = out.reshape(N, 2, 2, Cout, H, W)
    out = jnp.transpose(out, (0, 3, 4, 1, 5, 2)).reshape(N, Cout, 2 * H, 2 * W)
    return out.astype(jnp.float32)


def reference(x_nchw, weight):
    """Pure-JAX f32 reference matching PyTorch semantics."""
    N, Cin, H, W = x_nchw.shape
    Cout = weight.shape[1]
    # ConvTranspose2d, k=2, s=2, no bias
    y = jnp.einsum("nchw,cokl->nohkwl", x_nchw, weight).reshape(N, Cout, 2 * H, 2 * W)
    # InstanceNorm2d (affine=False), biased variance
    mean = y.mean(axis=(2, 3), keepdims=True)
    var = ((y - mean) ** 2).mean(axis=(2, 3), keepdims=True)
    yn = (y - mean) / jnp.sqrt(var + EPS)
    # LeakyReLU(0.2)
    return jnp.where(yn >= 0, yn, NEG_SLOPE * yn)


if __name__ == "__main__":
    N, Cin, Cout, H, W = 2, 4, 8, 16, 16

    key = jax.random.PRNGKey(0)
    kx, kw = jax.random.split(key)
    x = jax.random.normal(kx, (N, Cin, H, W), dtype=jnp.float32)
    # ConvTranspose2d weight, PyTorch layout (in_chans, out_chans, 2, 2)
    weight = 0.1 * jax.random.normal(kw, (Cin, Cout, 2, 2), dtype=jnp.float32)

    out = transpose_conv_block(x, weight)
    out = jax.block_until_ready(out)

    ref = reference(x, weight)
    assert out.shape == (N, Cout, 2 * H, 2 * W), out.shape
    # bf16 input feed + bf16 kernel output (f32 accumulation/normalization in-kernel)
    # => compare to the f32 reference at bf16-level tolerance.
    assert jnp.allclose(out, ref, rtol=2e-2, atol=2e-2), float(jnp.max(jnp.abs(out - ref)))

    print("KERNEL_OK")
</pallas_src>

<mosaic_0001>
module attributes {stable_mosaic.version = 11 : i64} {
  func.func @_transpose_conv_block_kernel(%arg0: i32, %arg1: memref<2x4x256xbf16, #tpu.memory_space<vmem>>, %arg2: memref<32x4xf32, #tpu.memory_space<vmem>>, %arg3: memref<2x32x256xbf16, #tpu.memory_space<vmem>>) attributes {dimension_semantics = [#tpu.dimension_semantics<parallel>], iteration_bounds = array<i64: 1>, scalar_prefetch = 0 : i64, scratch_operands = 0 : i64, tpu.core_type = #tpu.core_type<tc>, window_params = [{transform_indices = @transform_0, window_bounds = array<i64: 2, 4, 256>}, {pipeline_mode = #tpu.pipeline_mode<synchronous>, transform_indices = @transform_1, window_bounds = array<i64: 32, 4>}, {transform_indices = @transform_2, window_bounds = array<i64: 2, 32, 256>}]} {
    %c0 = arith.constant 0 : index
    %c0_0 = arith.constant 0 : index
    %0 = vector.load %arg2[%c0, %c0_0] : memref<32x4xf32, #tpu.memory_space<vmem>>, vector<32x4xf32>
    %c0_1 = arith.constant 0 : index
    %c0_2 = arith.constant 0 : index
    %c0_3 = arith.constant 0 : index
    %1 = vector.load %arg1[%c0_1, %c0_2, %c0_3] : memref<2x4x256xbf16, #tpu.memory_space<vmem>>, vector<2x1x256xbf16>
    %2 = arith.extf %1 : vector<2x1x256xbf16> to vector<2x1x256xf32>
    %3 = vector.extract_strided_slice %0 {offsets = [0, 0], sizes = [32, 1], strides = [1, 1]} : vector<32x4xf32> to vector<32x1xf32>
    %4 = vector.shape_cast %3 : vector<32x1xf32> to vector<1x32x1xf32>
    %5 = vector.broadcast %2 : vector<2x1x256xf32> to vector<2x32x256xf32>
    %6 = vector.broadcast %4 : vector<1x32x1xf32> to vector<2x32x256xf32>
    %7 = arith.mulf %5, %6 : vector<2x32x256xf32>
    %c0_4 = arith.constant 0 : index
    %c1 = arith.constant 1 : index
    %c0_5 = arith.constant 0 : index
    %8 = vector.load %arg1[%c0_4, %c1, %c0_5] : memref<2x4x256xbf16, #tpu.memory_space<vmem>>, vector<2x1x256xbf16>
    %9 = arith.extf %8 : vector<2x1x256xbf16> to vector<2x1x256xf32>
    %10 = vector.extract_strided_slice %0 {offsets = [0, 1], sizes = [32, 1], strides = [1, 1]} : vector<32x4xf32> to vector<32x1xf32>
    %11 = vector.shape_cast %10 : vector<32x1xf32> to vector<1x32x1xf32>
    %12 = vector.broadcast %9 : vector<2x1x256xf32> to vector<2x32x256xf32>
    %13 = vector.broadcast %11 : vector<1x32x1xf32> to vector<2x32x256xf32>
    %14 = arith.mulf %12, %13 : vector<2x32x256xf32>
    %15 = arith.addf %7, %14 : vector<2x32x256xf32>
    %c0_6 = arith.constant 0 : index
    %c2 = arith.constant 2 : index
    %c0_7 = arith.constant 0 : index
    %16 = vector.load %arg1[%c0_6, %c2, %c0_7] : memref<2x4x256xbf16, #tpu.memory_space<vmem>>, vector<2x1x256xbf16>
    %17 = arith.extf %16 : vector<2x1x256xbf16> to vector<2x1x256xf32>
    %18 = vector.extract_strided_slice %0 {offsets = [0, 2], sizes = [32, 1], strides = [1, 1]} : vector<32x4xf32> to vector<32x1xf32>
    %19 = vector.shape_cast %18 : vector<32x1xf32> to vector<1x32x1xf32>
    %20 = vector.broadcast %17 : vector<2x1x256xf32> to vector<2x32x256xf32>
    %21 = vector.broadcast %19 : vector<1x32x1xf32> to vector<2x32x256xf32>
    %22 = arith.mulf %20, %21 : vector<2x32x256xf32>
    %23 = arith.addf %15, %22 : vector<2x32x256xf32>
    %c0_8 = arith.constant 0 : index
    %c3 = arith.constant 3 : index
    %c0_9 = arith.constant 0 : index
    %24 = vector.load %arg1[%c0_8, %c3, %c0_9] : memref<2x4x256xbf16, #tpu.memory_space<vmem>>, vector<2x1x256xbf16>
    %25 = arith.extf %24 : vector<2x1x256xbf16> to vector<2x1x256xf32>
    %26 = vector.extract_strided_slice %0 {offsets = [0, 3], sizes = [32, 1], strides = [1, 1]} : vector<32x4xf32> to vector<32x1xf32>
    %27 = vector.shape_cast %26 : vector<32x1xf32> to vector<1x32x1xf32>
    %28 = vector.broadcast %25 : vector<2x1x256xf32> to vector<2x32x256xf32>
    %29 = vector.broadcast %27 : vector<1x32x1xf32> to vector<2x32x256xf32>
    %30 = arith.mulf %28, %29 : vector<2x32x256xf32>
    %31 = arith.addf %23, %30 : vector<2x32x256xf32>
    %cst = arith.constant dense<0.000000e+00> : vector<2x32xf32>
    %32 = vector.multi_reduction <add>, %31, %cst [2] : vector<2x32x256xf32> to vector<2x32xf32>
    %33 = vector.shape_cast %32 : vector<2x32xf32> to vector<2x32x1xf32>
    %34 = arith.mulf %31, %31 : vector<2x32x256xf32>
    %cst_10 = arith.constant dense<0.000000e+00> : vector<2x32xf32>
    %35 = vector.multi_reduction <add>, %34, %cst_10 [2] : vector<2x32x256xf32> to vector<2x32xf32>
    %36 = vector.shape_cast %35 : vector<2x32xf32> to vector<2x32x1xf32>
    %37 = vector.extract_strided_slice %33 {offsets = [0, 0, 0], sizes = [2, 8, 1], strides = [1, 1, 1]} : vector<2x32x1xf32> to vector<2x8x1xf32>
    %38 = vector.extract_strided_slice %33 {offsets = [0, 8, 0], sizes = [2, 8, 1], strides = [1, 1, 1]} : vector<2x32x1xf32> to vector<2x8x1xf32>
    %39 = arith.addf %37, %38 : vector<2x8x1xf32>
    %40 = vector.extract_strided_slice %33 {offsets = [0, 16, 0], sizes = [2, 8, 1], strides = [1, 1, 1]} : vector<2x32x1xf32> to vector<2x8x1xf32>
    %41 = arith.addf %39, %40 : vector<2x8x1xf32>
    %42 = vector.extract_strided_slice %33 {offsets = [0, 24, 0], sizes = [2, 8, 1], strides = [1, 1, 1]} : vector<2x32x1xf32> to vector<2x8x1xf32>
    %43 = arith.addf %41, %42 : vector<2x8x1xf32>
    %44 = vector.extract_strided_slice %36 {offsets = [0, 0, 0], sizes = [2, 8, 1], strides = [1, 1, 1]} : vector<2x32x1xf32> to vector<2x8x1xf32>
    %45 = vector.extract_strided_slice %36 {offsets = [0, 8, 0], sizes = [2, 8, 1], strides = [1, 1, 1]} : vector<2x32x1xf32> to vector<2x8x1xf32>
    %46 = arith.addf %44, %45 : vector<2x8x1xf32>
    %47 = vector.extract_strided_slice %36 {offsets = [0, 16, 0], sizes = [2, 8, 1], strides = [1, 1, 1]} : vector<2x32x1xf32> to vector<2x8x1xf32>
    %48 = arith.addf %46, %47 : vector<2x8x1xf32>
    %49 = vector.extract_strided_slice %36 {offsets = [0, 24, 0], sizes = [2, 8, 1], strides = [1, 1, 1]} : vector<2x32x1xf32> to vector<2x8x1xf32>
    %50 = arith.addf %48, %49 : vector<2x8x1xf32>
    %cst_11 = arith.constant 9.765625E-4 : f32
    %51 = vector.broadcast %cst_11 : f32 to vector<2x8x1xf32>
    %52 = arith.mulf %43, %51 : vector<2x8x1xf32>
    %cst_12 = arith.constant 9.765625E-4 : f32
    %53 = vector.broadcast %cst_12 : f32 to vector<2x8x1xf32>
    %54 = arith.mulf %50, %53 : vector<2x8x1xf32>
    %55 = arith.mulf %52, %52 : vector<2x8x1xf32>
    %56 = arith.subf %54, %55 : vector<2x8x1xf32>
    %cst_13 = arith.constant 0.000000e+00 : f32
    %57 = vector.broadcast %cst_13 : f32 to vector<2x8x1xf32>
    %58 = arith.maximumf %56, %57 : vector<2x8x1xf32>
    %cst_14 = arith.constant 9.99999974E-6 : f32
    %59 = vector.broadcast %cst_14 : f32 to vector<2x8x1xf32>
    %60 = arith.addf %58, %59 : vector<2x8x1xf32>
    %61 = math.rsqrt %60 : vector<2x8x1xf32>
    %62 = vector.extract_strided_slice %31 {offsets = [0, 0, 0], sizes = [2, 8, 256], strides = [1, 1, 1]} : vector<2x32x256xf32> to vector<2x8x256xf32>
    %63 = vector.broadcast %52 : vector<2x8x1xf32> to vector<2x8x256xf32>
    %64 = arith.subf %62, %63 : vector<2x8x256xf32>
    %65 = vector.broadcast %61 : vector<2x8x1xf32> to vector<2x8x256xf32>
    %66 = arith.mulf %64, %65 : vector<2x8x256xf32>
    %cst_15 = arith.constant 0.000000e+00 : f32
    %67 = vector.broadcast %cst_15 : f32 to vector<2x8x256xf32>
    %68 = arith.cmpf oge, %66, %67 : vector<2x8x256xf32>
    %cst_16 = arith.constant 2.000000e-01 : f32
    %69 = vector.broadcast %cst_16 : f32 to vector<2x8x256xf32>
    %70 = arith.mulf %69, %66 : vector<2x8x256xf32>
    %71 = arith.select %68, %66, %70 : vector<2x8x256xi1>, vector<2x8x256xf32>
    %72 = arith.truncf %71 : vector<2x8x256xf32> to vector<2x8x256xbf16>
    %c0_17 = arith.constant 0 : index
    %c0_18 = arith.constant 0 : index
    %c0_19 = arith.constant 0 : index
    %73 = vector.load %arg3[%c0_17, %c0_18, %c0_19] : memref<2x32x256xbf16, #tpu.memory_space<vmem>>, vector<2x8x256xbf16>
    tpu.vector_store %arg3[%c0_17, %c0_18, %c0_19], %72 {strides = array<i32>} : memref<2x32x256xbf16, #tpu.memory_space<vmem>>, vector<2x8x256xbf16>,
    %74 = vector.extract_strided_slice %31 {offsets = [0, 8, 0], sizes = [2, 8, 256], strides = [1, 1, 1]} : vector<2x32x256xf32> to vector<2x8x256xf32>
    %75 = vector.broadcast %52 : vector<2x8x1xf32> to vector<2x8x256xf32>
    %76 = arith.subf %74, %75 : vector<2x8x256xf32>
    %77 = vector.broadcast %61 : vector<2x8x1xf32> to vector<2x8x256xf32>
    %78 = arith.mulf %76, %77 : vector<2x8x256xf32>
    %cst_20 = arith.constant 0.000000e+00 : f32
    %79 = vector.broadcast %cst_20 : f32 to vector<2x8x256xf32>
    %80 = arith.cmpf oge, %78, %79 : vector<2x8x256xf32>
    %cst_21 = arith.constant 2.000000e-01 : f32
    %81 = vector.broadcast %cst_21 : f32 to vector<2x8x256xf32>
    %82 = arith.mulf %81, %78 : vector<2x8x256xf32>
    %83 = arith.select %80, %78, %82 : vector<2x8x256xi1>, vector<2x8x256xf32>
    %84 = arith.truncf %83 : vector<2x8x256xf32> to vector<2x8x256xbf16>
    %c0_22 = arith.constant 0 : index
    %c8 = arith.constant 8 : index
    %c0_23 = arith.constant 0 : index
    %85 = vector.load %arg3[%c0_22, %c8, %c0_23] : memref<2x32x256xbf16, #tpu.memory_space<vmem>>, vector<2x8x256xbf16>
    tpu.vector_store %arg3[%c0_22, %c8, %c0_23], %84 {strides = array<i32>} : memref<2x32x256xbf16, #tpu.memory_space<vmem>>, vector<2x8x256xbf16>,
    %86 = vector.extract_strided_slice %31 {offsets = [0, 16, 0], sizes = [2, 8, 256], strides = [1, 1, 1]} : vector<2x32x256xf32> to vector<2x8x256xf32>
    %87 = vector.broadcast %52 : vector<2x8x1xf32> to vector<2x8x256xf32>
    %88 = arith.subf %86, %87 : vector<2x8x256xf32>
    %89 = vector.broadcast %61 : vector<2x8x1xf32> to vector<2x8x256xf32>
    %90 = arith.mulf %88, %89 : vector<2x8x256xf32>
    %cst_24 = arith.constant 0.000000e+00 : f32
    %91 = vector.broadcast %cst_24 : f32 to vector<2x8x256xf32>
    %92 = arith.cmpf oge, %90, %91 : vector<2x8x256xf32>
    %cst_25 = arith.constant 2.000000e-01 : f32
    %93 = vector.broadcast %cst_25 : f32 to vector<2x8x256xf32>
    %94 = arith.mulf %93, %90 : vector<2x8x256xf32>
    %95 = arith.select %92, %90, %94 : vector<2x8x256xi1>, vector<2x8x256xf32>
    %96 = arith.truncf %95 : vector<2x8x256xf32> to vector<2x8x256xbf16>
    %c0_26 = arith.constant 0 : index
    %c16 = arith.constant 16 : index
    %c0_27 = arith.constant 0 : index
    %97 = vector.load %arg3[%c0_26, %c16, %c0_27] : memref<2x32x256xbf16, #tpu.memory_space<vmem>>, vector<2x8x256xbf16>
    tpu.vector_store %arg3[%c0_26, %c16, %c0_27], %96 {strides = array<i32>} : memref<2x32x256xbf16, #tpu.memory_space<vmem>>, vector<2x8x256xbf16>,
    %98 = vector.extract_strided_slice %31 {offsets = [0, 24, 0], sizes = [2, 8, 256], strides = [1, 1, 1]} : vector<2x32x256xf32> to vector<2x8x256xf32>
    %99 = vector.broadcast %52 : vector<2x8x1xf32> to vector<2x8x256xf32>
    %100 = arith.subf %98, %99 : vector<2x8x256xf32>
    %101 = vector.broadcast %61 : vector<2x8x1xf32> to vector<2x8x256xf32>
    %102 = arith.mulf %100, %101 : vector<2x8x256xf32>
    %cst_28 = arith.constant 0.000000e+00 : f32
    %103 = vector.broadcast %cst_28 : f32 to vector<2x8x256xf32>
    %104 = arith.cmpf oge, %102, %103 : vector<2x8x256xf32>
    %cst_29 = arith.constant 2.000000e-01 : f32
    %105 = vector.broadcast %cst_29 : f32 to vector<2x8x256xf32>
    %106 = arith.mulf %105, %102 : vector<2x8x256xf32>
    %107 = arith.select %104, %102, %106 : vector<2x8x256xi1>, vector<2x8x256xf32>
    %108 = arith.truncf %107 : vector<2x8x256xf32> to vector<2x8x256xbf16>
    %c0_30 = arith.constant 0 : index
    %c24 = arith.constant 24 : index
    %c0_31 = arith.constant 0 : index
    %109 = vector.load %arg3[%c0_30, %c24, %c0_31] : memref<2x32x256xbf16, #tpu.memory_space<vmem>>, vector<2x8x256xbf16>
    tpu.vector_store %arg3[%c0_30, %c24, %c0_31], %108 {strides = array<i32>} : memref<2x32x256xbf16, #tpu.memory_space<vmem>>, vector<2x8x256xbf16>,
    return
  }
  func.func @transform_0(%arg0: i32) -> (i32, i32, i32) {
    %c0_i32 = arith.constant 0 : i32
    %c0_i32_0 = arith.constant 0 : i32
    %c0_i32_1 = arith.constant 0 : i32
    return %arg0, %c0_i32, %c0_i32_0 : i32, i32, i32
  }
  func.func @transform_1(%arg0: i32) -> (i32, i32) {
    %c0_i32 = arith.constant 0 : i32
    %c0_i32_0 = arith.constant 0 : i32
    %c0_i32_1 = arith.constant 0 : i32
    return %c0_i32, %c0_i32_0 : i32, i32
  }
  func.func @transform_2(%arg0: i32) -> (i32, i32, i32) {
    %c0_i32 = arith.constant 0 : i32
    %c0_i32_0 = arith.constant 0 : i32
    %c0_i32_1 = arith.constant 0 : i32
    return %arg0, %c0_i32, %c0_i32_0 : i32, i32, i32
  }
}

</mosaic_0001>

<bundles_post_ra>
// kernel: tpu_custom_call.1
= control target key start
LH: loop header
LB: loop body
LE: loop exit
PB: predicated region body
PF: predicated region fallthrough
CT: control target
= control target key end

     0   :  { %v672_v1 = vmov 1   ;;  %v673_v2 = vmov 0   ;;  %s960_s0 = inlined_call_operand.vmem [shape: bf16[2,4,256], index: 0, kind: input, shape index: {}]   ;;  %s961_s1 = inlined_call_operand.vmem [shape: f32[32,4], index: 1, kind: input, shape index: {}]   ;;  %s962_s2 = inlined_call_operand.hbm [shape: bf16[2,32,256], index: 2, kind: output, shape index: {}]  }
   0x1   :  { %v12_v0 = vld [vmem:[%s961_s1] sm:$0xff]  ;;  %634 = vset.pattern.permute.xlu1 %v672_v1  ;;  %633 = vset.pattern.permute.xlu0 %v673_v2 }
   0x2   :  { %131 = vperm.xlu1 %634, %v12_v0   ;;  %60 = vperm.xlu0 %633, %v12_v0  }
   0x3   :  { %7 = vsyncpa [#allocation3], 0  ;;  %v13_v3 = vld [vmem:[%s961_s1 + $0x8] sm:$0xff]  ;;  %v14_v4 = vld [vmem:[%s961_s1 + $0x10] sm:$0xff]  ;;  %v674_v5 = vmov 2   ;;  %v675_v7 = vmov 3   ;;  %v22_v8 = vlaneseq }
   0x4   :  { %v15_v6 = vld [vmem:[%s961_s1 + $0x18] sm:$0xff]  ;;  %v16_v10 = vld [vmem:[%s960_s0] sm:$0x5]  ;;  %v17_v11 = vld [vmem:[%s960_s0 + $0x4] sm:$0x5] }
   0x5   :  { %v23_v9 = vshrl.u32 %v22_v8, 7  ;;  %v18_v12 = vunpack.c.l.bf16 %v16_v10  ;;  %v178_v17 = vld [vmem:[%s960_s0] sm:$0xa]  ;;  %v179_v18 = vld [vmem:[%s960_s0 + $0x4] sm:$0xa]  ;;  %v19_v19 = vunpack.c.l.bf16 %v17_v11  ;;  %s676_s0 = smov [#allocation2]  }
   0x6   :  { %135 = vperm.xlu1 %634, %v13_v3   ;;  %65 = vperm.xlu0 %633, %v13_v3   ;;  %v180_v22 = vunpack.c.l.bf16 %v178_v17  ;;  %v181_v23 = vunpack.c.l.bf16 %v179_v18  ;;  %s599_s24 = sshll.u32 %s676_s0, 4  ;;  %s600_s24 = int_to_ptr.vmem [resolvable:$true] %s599_s24 }
   0x7   :  { %v96_v13 = vsub.s32 1, %v23_v9  ;;  %v100_v14 = vsub.s32 5, %v23_v9  ;;  %v24_v20 = vsub.s32 0, %v23_v9  ;;  %v28_v21 = vsub.s32 4, %v23_v9  ;;  %s648_s25 = scalar_lea.vmem %s600_s24, 1024  ;;  %p653_p1 = scmp.lt.s32.totalorder %s600_s24, %s600_s24 }
   0x8   :  { %v186_v24 = vsub.s32 2, %v23_v9  ;;  %v190_v35 = vsub.s32 6, %v23_v9  ;;  %v270_v38 = vsub.s32 3, %v23_v9  ;;  %v274_v39 = vsub.s32 7, %v23_v9  ;;  %p649_p0 = scmp.ne.s32.totalorder %s600_s24, %s648_s25  ;;  %p654_p2 = scmp.lt.s32.totalorder %s648_s25, %s648_s25 }
   0x9   :  { %v97_v25 = vrot.slane %v18_v12, %v96_v13  ;;  %v101_v26 = vrot.slane %v18_v12, %v100_v14  ;;  %v105_v29 = vrot.slane %v19_v19, %v96_v13  ;;  %v109_v30 = vrot.slane %v19_v19, %v100_v14 }
   0xa   :  { %139 = vperm.xlu1 %634, %v14_v4   ;;  %70 = vperm.xlu0 %633, %v14_v4   ;;  %v25_v31 = vrot.slane %v18_v12, %v24_v20  ;;  %v29_v32 = vrot.slane %v18_v12, %v28_v21  ;;  %v33_v33 = vrot.slane %v19_v19, %v24_v20  ;;  %p655_p3 = por %p654_p2, %p653_p1 }
   0xb   :  { %v37_v34 = vrot.slane %v19_v19, %v28_v21  ;;  %v187_v36 = vrot.slane %v180_v22, %v186_v24  ;;  %v195_v37 = vrot.slane %v181_v23, %v186_v24  ;;  %v718_v40 = vrot.slane %v97_v25, %v96_v13 }
   0xc   :  { %v720_v41 = vrot.slane %v101_v26, %v96_v13  ;;  %v724_v44 = vrot.slane %v105_v29, %v96_v13  ;;  %v726_v45 = vrot.slane %v109_v30, %v96_v13  ;;  %v728_v46 = vrot.slane %v25_v31, %v24_v20  ;;  %p656_p4 = pnand %p655_p3, %p649_p0 }
   0xd   :  { %v730_v47 = vrot.slane %v29_v32, %v24_v20  ;;  %v732_v48 = vrot.slane %v33_v33, %v24_v20  ;;  %v734_v49 = vrot.slane %v37_v34, %v24_v20  ;;  %v191_v50 = vrot.slane %v180_v22, %v190_v35 }
   0xe   :  { %636 = vset.pattern.permute.xlu1 %v674_v5  ;;  %635 = vset.pattern.permute.xlu0 %v674_v5  ;;  %v199_v51 = vrot.slane %v181_v23, %v190_v35  ;;  %v736_v52 = vrot.slane %v187_v36, %v186_v24  ;;  %v738_v53 = vrot.slane %v195_v37, %v186_v24 }
   0xf   :  { %225 = vperm.xlu1 %636, %v13_v3   ;;  %221 = vperm.xlu0 %635, %v12_v0   ;;  %v271_v54 = vrot.slane %v180_v22, %v270_v38  ;;  %v275_v55 = vrot.slane %v180_v22, %v274_v39  ;;  %v279_v58 = vrot.slane %v181_v23, %v270_v38 }
  0x10   :  { %v283_v59 = vrot.slane %v181_v23, %v274_v39  ;;  %v754_v10 = vrot.slane %v191_v50, %v186_v24  ;;  %v756_v11 = vrot.slane %v199_v51, %v186_v24 }
  0x11   :  { %v758_v12 = vrot.slane %v271_v54, %v270_v38  ;;  %v760_v13 = vrot.slane %v275_v55, %v270_v38 }
  0x12   :  { %v766_v17 = vrot.slane %v283_v59, %v270_v38 }
  0x13   :  { %637 = vset.pattern.permute.xlu1 %v673_v2  ;;  %638 = vset.pattern.permute.xlu0 %v672_v1 }
  0x14   :  { %75 = vperm.xlu1 %637, %v15_v6   ;;  %143 = vperm.xlu0 %638, %v15_v6  }
  0x18   :  { %639 = vset.pattern.permute.xlu1 %v674_v5  ;;  %641 = vset.pattern.permute.xlu0 %v675_v7 }
  0x19   :  { %229 = vperm.xlu1 %639, %v14_v4   ;;  %309 = vperm.xlu0 %641, %v13_v3  }
  0x1d   :  { %640 = vset.pattern.permute.xlu1 %v675_v7  ;;  %317 = vperm.xlu0 %641, %v15_v6  }
  0x1e   :  { %305 = vperm.xlu1 %640, %v12_v0  }
  0x22   :  { %642 = vset.pattern.permute.xlu1 %v674_v5 }
  0x23   :  { %233 = vperm.xlu1 %642, %v15_v6  }
  0x27   :  { %643 = vset.pattern.permute.xlu1 %v675_v7 }
  0x28   :  { %313 = vperm.xlu1 %643, %v14_v4  }
  0x81   :  { %v132_v15 = vpop.permute.xlu1 %131  ;;  %v61_v16 = vpop.permute.xlu0 %60 }
  0x82   :  { %v146_v56 = vmul.f32 %v132_v15, %v718_v40  ;;  %v147_v57 = vmul.f32 %v132_v15, %v720_v41  ;;  %v154_v60 = vmul.f32 %v132_v15, %v724_v44  ;;  %v155_v61 = vmul.f32 %v132_v15, %v726_v45 }
  0x83   :  { %v78_v62 = vmul.f32 %v61_v16, %v728_v46  ;;  %v79_v63 = vmul.f32 %v61_v16, %v730_v47  ;;  %v86_v2 = vmul.f32 %v61_v16, %v732_v48  ;;  %v87_v3 = vmul.f32 %v61_v16, %v734_v49 }
  0x84   :  { %v764_v16 = vrot.slane %v279_v58, %v270_v38 }
  0x85   :  { %v136_v27 = vpop.permute.xlu1 %135  ;;  %v66_v28 = vpop.permute.xlu0 %65  ;;  %v162_v18 = vadd.f32 %v146_v56, %v78_v62  ;;  %v163_v19 = vadd.f32 %v147_v57, %v79_v63  ;;  %v170_v20 = vadd.f32 %v154_v60, %v86_v2  ;;  %v171_v21 = vadd.f32 %v155_v61, %v87_v3 }
  0x86   :  { %v148_v4 = vmul.f32 %v136_v27, %v718_v40  ;;  %v149_v5 = vmul.f32 %v136_v27, %v720_v41  ;;  %v156_v6 = vmul.f32 %v136_v27, %v724_v44  ;;  %v80_v7 = vmul.f32 %v66_v28, %v728_v46 }
  0x87   :  { %v81_v8 = vmul.f32 %v66_v28, %v730_v47  ;;  %v88_v9 = vmul.f32 %v66_v28, %v732_v48  ;;  %v157_v14 = vmul.f32 %v136_v27, %v726_v45  ;;  %v89_v15 = vmul.f32 %v66_v28, %v734_v49 }
  0x88   :  { %v164_v24 = vadd.f32 %v148_v4, %v80_v7 }
  0x89   :  { %v140_v42 = vpop.permute.xlu1 %139  ;;  %v722_v43 = vpop.permute.xlu0 %70  ;;  %v165_v25 = vadd.f32 %v149_v5, %v81_v8  ;;  %v172_v26 = vadd.f32 %v156_v6, %v88_v9  ;;  %v173_v32 = vadd.f32 %v157_v14, %v89_v15 }
  0x8a   :  { %v150_v29 = vmul.f32 %v140_v42, %v718_v40  ;;  %v82_v27 = vmul.f32 %v722_v43, %v728_v46  ;;  %v151_v33 = vmul.f32 %v140_v42, %v720_v41  ;;  %v158_v36 = vmul.f32 %v140_v42, %v724_v44 }
  0x8b   :  { %v159_v50 = vmul.f32 %v140_v42, %v726_v45  ;;  %v83_v51 = vmul.f32 %v722_v43, %v730_v47  ;;  %v90_v54 = vmul.f32 %v722_v43, %v732_v48  ;;  %v91_v55 = vmul.f32 %v722_v43, %v734_v49 }
  0x8c   :  { %v166_v58 = vadd.f32 %v150_v29, %v82_v27 }
  0x8e   :  { %v226_v0 = vpop.permute.xlu1 %225  ;;  %v222_v1 = vpop.permute.xlu0 %221 }
  0x8f   :  { %v238_v28 = vmul.f32 %v226_v0, %v736_v52  ;;  %v239_v30 = vmul.f32 %v226_v0, %v754_v10  ;;  %v246_v31 = vmul.f32 %v226_v0, %v738_v53  ;;  %v247_v34 = vmul.f32 %v226_v0, %v756_v11 }
  0x90   :  { %v236_v35 = vmul.f32 %v222_v1, %v736_v52  ;;  %v237_v37 = vmul.f32 %v222_v1, %v754_v10  ;;  %v244_v38 = vmul.f32 %v222_v1, %v738_v53  ;;  %v245_v39 = vmul.f32 %v222_v1, %v756_v11 }
  0x91   :  { %v254_v59 = vadd.f32 %v238_v28, %v164_v24  ;;  %v255_v60 = vadd.f32 %v239_v30, %v165_v25  ;;  %v262_v61 = vadd.f32 %v246_v31, %v172_v26  ;;  %v263_v62 = vadd.f32 %v247_v34, %v173_v32 }
  0x92   :  { %v252_v63 = vadd.f32 %v236_v35, %v162_v18  ;;  %v253_v1 = vadd.f32 %v237_v37, %v163_v19  ;;  %v260_v2 = vadd.f32 %v244_v38, %v170_v20  ;;  %v261_v3 = vadd.f32 %v245_v39, %v171_v21 }
  0x93   :  { %v76_v22 = vpop.permute.xlu1 %75  ;;  %v144_v23 = vpop.permute.xlu0 %143  ;;  %v167_v38 = vadd.f32 %v151_v33, %v83_v51  ;;  %v174_v39 = vadd.f32 %v158_v36, %v90_v54 }
  0x94   :  { %v84_v4 = vmul.f32 %v76_v22, %v728_v46  ;;  %v85_v5 = vmul.f32 %v76_v22, %v730_v47  ;;  %v92_v43 = vmul.f32 %v76_v22, %v732_v48  ;;  %v93_v8 = vmul.f32 %v76_v22, %v734_v49 }
  0x95   :  { %v152_v9 = vmul.f32 %v144_v23, %v718_v40  ;;  %v153_v20 = vmul.f32 %v144_v23, %v720_v41  ;;  %v160_v21 = vmul.f32 %v144_v23, %v724_v44  ;;  %v161_v49 = vmul.f32 %v144_v23, %v726_v45 }
  0x98   :  { %v230_v56 = vpop.permute.xlu1 %229  ;;  %v310_v57 = vpop.permute.xlu0 %309 }
  0x99   :  { %v322_v0 = vmul.f32 %v310_v57, %v758_v12  ;;  %v323_v42 = vmul.f32 %v310_v57, %v760_v13  ;;  %v330_v14 = vmul.f32 %v310_v57, %v764_v16  ;;  %v331_v15 = vmul.f32 %v310_v57, %v766_v17 }
  0x9a   :  { %v240_v29 = vmul.f32 %v230_v56, %v736_v52  ;;  %v241_v27 = vmul.f32 %v230_v56, %v754_v10  ;;  %v248_v41 = vmul.f32 %v230_v56, %v738_v53  ;;  %v249_v44 = vmul.f32 %v230_v56, %v756_v11 }
  0x9b   :  { %v793_v6 = vadd.f32 %v322_v0, %v254_v59  ;;  %v795_v7 = vadd.f32 %v323_v42, %v255_v60  ;;  %v826_v30 = vadd.f32 %v330_v14, %v262_v61  ;;  %v828_v31 = vadd.f32 %v331_v15, %v263_v62 }
  0x9c   :  { %v175_v56 = vadd.f32 %v159_v50, %v91_v55  ;;  %v168_v57 = vadd.f32 %v152_v9, %v84_v4  ;;  %v169_v59 = vadd.f32 %v153_v20, %v85_v5  ;;  %v176_v60 = vadd.f32 %v160_v21, %v92_v43 }
  0x9d   :  { %v306_v18 = vpop.permute.xlu1 %305  ;;  %v355_v40 = vadd.f32 %v795_v7, %v793_v6  ;;  %v256_v61 = vadd.f32 %v240_v29, %v166_v58  ;;  %v257_v62 = vadd.f32 %v241_v27, %v167_v38  ;;  %v264_v0 = vadd.f32 %v248_v41, %v174_v39 }
  0x9e   :  { %v320_v19 = vmul.f32 %v306_v18, %v758_v12  ;;  %v321_v46 = vmul.f32 %v306_v18, %v760_v13  ;;  %v328_v47 = vmul.f32 %v306_v18, %v764_v16  ;;  %v329_v48 = vmul.f32 %v306_v18, %v766_v17 }
  0x9f   :  { %356 = vadd.xlane.f32.xlu0 %v355_v40  ;;  %v265_v42 = vadd.f32 %v249_v44, %v175_v56  ;;  %v378_v18 = vmul.f32 %v793_v6, %v793_v6  ;;  %v386_v21 = vmul.f32 %v826_v30, %v826_v30 }
  0xa0   :  { %v810_v22 = vadd.f32 %v320_v19, %v252_v63  ;;  %v812_v24 = vadd.f32 %v321_v46, %v253_v1  ;;  %v814_v25 = vadd.f32 %v328_v47, %v260_v2  ;;  %v816_v26 = vadd.f32 %v329_v48, %v261_v3 }
  0xa1   :  { %v177_v63 = vadd.f32 %v161_v49, %v93_v8  ;;  %v379_v19 = vmul.f32 %v795_v7, %v795_v7  ;;  %v387_v49 = vmul.f32 %v828_v31, %v828_v31 }
  0xa2   :  { %v234_v45 = vpop.permute.xlu1 %233  ;;  %v352_v23 = vadd.f32 %v812_v24, %v810_v22  ;;  %v364_v28 = vadd.f32 %v816_v26, %v814_v25  ;;  %v376_v48 = vmul.f32 %v810_v22, %v810_v22  ;;  %v377_v20 = vmul.f32 %v812_v24, %v812_v24 }
  0xa3   :  { %v242_v32 = vmul.f32 %v234_v45, %v736_v52  ;;  %v243_v34 = vmul.f32 %v234_v45, %v754_v10  ;;  %v250_v35 = vmul.f32 %v234_v45, %v738_v53  ;;  %v251_v37 = vmul.f32 %v234_v45, %v756_v11  ;;  %v318_v52 = vpop.permute.xlu0 %317 }
  0xa4   :  { %353 = vadd.xlane.f32.xlu1 %v352_v23  ;;  %365 = vadd.xlane.f32.xlu0 %v364_v28  ;;  %v367_v10 = vadd.f32 %v828_v31, %v826_v30  ;;  %v326_v58 = vmul.f32 %v318_v52, %v758_v12  ;;  %v327_v2 = vmul.f32 %v318_v52, %v760_v13 }
  0xa5   :  { %v258_v53 = vadd.f32 %v242_v32, %v168_v57  ;;  %v259_v1 = vadd.f32 %v243_v34, %v169_v59  ;;  %v266_v11 = vadd.f32 %v250_v35, %v176_v60  ;;  %v267_v33 = vadd.f32 %v251_v37, %v177_v63 }
  0xa6   :  { %v334_v3 = vmul.f32 %v318_v52, %v764_v16  ;;  %v335_v4 = vmul.f32 %v318_v52, %v766_v17  ;;  %v384_v40 = vmul.f32 %v814_v25, %v814_v25  ;;  %v385_v29 = vmul.f32 %v816_v26, %v816_v26 }
  0xa7   :  { %v314_v36 = vpop.permute.xlu1 %313  ;;  %v395_v27 = vadd.f32 %v379_v19, %v378_v18  ;;  %v392_v41 = vadd.f32 %v377_v20, %v376_v48  ;;  %v407_v44 = vadd.f32 %v387_v49, %v386_v21 }
  0xa8   :  { %v324_v50 = vmul.f32 %v314_v36, %v758_v12  ;;  %v325_v51 = vmul.f32 %v314_v36, %v760_v13  ;;  %v332_v54 = vmul.f32 %v314_v36, %v764_v16  ;;  %v333_v55 = vmul.f32 %v314_v36, %v766_v17  ;;  %368 = vadd.xlane.f32.xlu1 %v367_v10 }
  0xa9   :  { %v852_v14 = vadd.f32 %v334_v3, %v266_v11  ;;  %v854_v15 = vadd.f32 %v335_v4, %v267_v33  ;;  %v860_v16 = vadd.f32 %v326_v58, %v258_v53  ;;  %v862_v17 = vadd.f32 %v327_v2, %v259_v1 }
  0xaa   :  { %v844_v5 = vadd.f32 %v332_v54, %v264_v0  ;;  %v846_v43 = vadd.f32 %v333_v55, %v265_v42  ;;  %v848_v8 = vadd.f32 %v324_v50, %v256_v61  ;;  %v850_v9 = vadd.f32 %v325_v51, %v257_v62 }
  0xab   :  { %v373_v46 = vadd.f32 %v854_v15, %v852_v14  ;;  %v361_v47 = vadd.f32 %v862_v17, %v860_v16  ;;  %v404_v45 = vadd.f32 %v385_v29, %v384_v40  ;;  %v390_v35 = vmul.f32 %v852_v14, %v852_v14 }
  0xac   :  { %v370_v12 = vadd.f32 %v846_v43, %v844_v5  ;;  %v358_v13 = vadd.f32 %v850_v9, %v848_v8  ;;  %v388_v23 = vmul.f32 %v844_v5, %v844_v5  ;;  %v389_v28 = vmul.f32 %v846_v43, %v846_v43 }
  0xad   :  { %v380_v32 = vmul.f32 %v848_v8, %v848_v8  ;;  %v381_v34 = vmul.f32 %v850_v9, %v850_v9  ;;  %v391_v37 = vmul.f32 %v854_v15, %v854_v15  ;;  %v382_v56 = vmul.f32 %v860_v16, %v860_v16 }
  0xae   :  { %371 = vadd.xlane.f32.xlu1 %v370_v12  ;;  %359 = vadd.xlane.f32.xlu0 %v358_v13  ;;  %v410_v38 = vadd.f32 %v389_v28, %v388_v23  ;;  %v383_v57 = vmul.f32 %v862_v17, %v862_v17 }
  0xaf   :  { %v398_v39 = vadd.f32 %v381_v34, %v380_v32  ;;  %v413_v59 = vadd.f32 %v391_v37, %v390_v35 }
  0xb0   :  { %v401_v60 = vadd.f32 %v383_v57, %v382_v56 }
  0xb2   :  { %374 = vadd.xlane.f32.xlu1 %v373_v46  ;;  %362 = vadd.xlane.f32.xlu0 %v361_v47 }
  0xb6   :  { %396 = vadd.xlane.f32.xlu1 %v395_v27  ;;  %393 = vadd.xlane.f32.xlu0 %v392_v41 }
  0xba   :  { %408 = vadd.xlane.f32.xlu1 %v407_v44  ;;  %405 = vadd.xlane.f32.xlu0 %v404_v45 }
  0xbe   :  { %411 = vadd.xlane.f32.xlu1 %v410_v38  ;;  %399 = vadd.xlane.f32.xlu0 %v398_v39 }
  0xc2   :  { %414 = vadd.xlane.f32.xlu1 %v413_v59  ;;  %402 = vadd.xlane.f32.xlu0 %v401_v60 }
 0x12c   :  { %v357_v63 = vpop.xlane.xlu0 %356 }
 0x131   :  { %v354_v61 = vpop.xlane.xlu1 %353  ;;  %v366_v62 = vpop.xlane.xlu0 %365 }
 0x132   :  { %v416_v33 = vadd.f32 %v357_v63, %v354_v61 }
 0x135   :  { %v369_v0 = vpop.xlane.xlu1 %368 }
 0x136   :  { %v417_v36 = vadd.f32 %v369_v0, %v366_v62 }
 0x13b   :  { %v372_v42 = vpop.xlane.xlu1 %371  ;;  %v360_v52 = vpop.xlane.xlu0 %359 }
 0x13c   :  { %v419_v54 = vadd.f32 %v417_v36, %v372_v42  ;;  %v418_v55 = vadd.f32 %v416_v33, %v360_v52 }
 0x13f   :  { %v375_v10 = vpop.xlane.xlu1 %374  ;;  %v363_v53 = vpop.xlane.xlu0 %362 }
 0x140   :  { %v421_v58 = vadd.f32 %v419_v54, %v375_v10  ;;  %v420_v2 = vadd.f32 %v418_v55, %v363_v53 }
 0x142   :  { %v900_v18 = vmul.f32 0.0009765625, %v421_v58  ;;  %v902_v19 = vmul.f32 0.0009765625, %v420_v2 }
 0x143   :  { %v397_v1 = vpop.xlane.xlu1 %396  ;;  %v394_v11 = vpop.xlane.xlu0 %393 }
 0x144   :  { %v422_v12 = vadd.f32 %v397_v1, %v394_v11  ;;  %v433_v29 = vmul.f32 %v900_v18, %v900_v18  ;;  %v432_v27 = vmul.f32 %v902_v19, %v902_v19  ;;  %v444_v35 = vsub.f32 %v814_v25, %v900_v18 }
 0x145   :  { %v445_v37 = vsub.f32 %v816_v26, %v900_v18  ;;  %v482_v38 = vsub.f32 %v826_v30, %v900_v18  ;;  %v483_v39 = vsub.f32 %v828_v31, %v900_v18  ;;  %v520_v56 = vsub.f32 %v844_v5, %v900_v18 }
 0x146   :  { %v521_v57 = vsub.f32 %v846_v43, %v900_v18  ;;  %v558_v59 = vsub.f32 %v852_v14, %v900_v18  ;;  %v559_v25 = vsub.f32 %v854_v15, %v900_v18  ;;  %v442_v26 = vsub.f32 %v810_v22, %v902_v19 }
 0x147   :  { %v409_v50 = vpop.xlane.xlu1 %408  ;;  %v406_v51 = vpop.xlane.xlu0 %405  ;;  %v443_v30 = vsub.f32 %v812_v24, %v902_v19  ;;  %v480_v31 = vsub.f32 %v793_v6, %v902_v19  ;;  %v481_v5 = vsub.f32 %v795_v7, %v902_v19  ;;  %v518_v43 = vsub.f32 %v848_v8, %v902_v19 }
 0x148   :  { %v423_v13 = vadd.f32 %v409_v50, %v406_v51  ;;  %v519_v63 = vsub.f32 %v850_v9, %v902_v19  ;;  %v556_v61 = vsub.f32 %v860_v16, %v902_v19  ;;  %v557_v22 = vsub.f32 %v862_v17, %v902_v19 }
 0x14b   :  { %v412_v3 = vpop.xlane.xlu1 %411  ;;  %v400_v4 = vpop.xlane.xlu0 %399 }
 0x14c   :  { %v425_v46 = vadd.f32 %v423_v13, %v412_v3  ;;  %v424_v47 = vadd.f32 %v422_v12, %v400_v4 }
 0x14f   :  { %v415_v48 = vpop.xlane.xlu1 %414  ;;  %v403_v20 = vpop.xlane.xlu0 %402 }
 0x150   :  { %v427_v21 = vadd.f32 %v425_v46, %v415_v48  ;;  %v426_v49 = vadd.f32 %v424_v47, %v403_v20 }
 0x152   :  { %v431_v40 = vmul.f32 0.0009765625, %v427_v21  ;;  %v430_v41 = vmul.f32 0.0009765625, %v426_v49 }
 0x154   :  { %v435_v44 = vsub.f32 %v431_v40, %v433_v29  ;;  %v434_v45 = vsub.f32 %v430_v41, %v432_v27 }
 0x156   :  { %v437_v23 = vmax.f32 %v435_v44, 0.0  ;;  %v436_v28 = vmax.f32 %v434_v45, 0.0 }
 0x158   :  { %v439_v32 = vadd.f32 1e-05, %v437_v23  ;;  %v438_v34 = vadd.f32 1e-05, %v436_v28 }
 0x15a   :  { %644 = vrsqrt.f32 %v439_v32 }
 0x15b   :  { %646 = vrsqrt.f32 %v438_v34 }
 0x164   :  { %v645_v60 = vpop.eup %644 }
 0x165   :  { %v647_v24 = vpop.eup %646  ;;  %v448_v62 = vmul.f32 %v645_v60, %v444_v35  ;;  %v449_v0 = vmul.f32 %v645_v60, %v445_v37  ;;  %v486_v6 = vmul.f32 %v645_v60, %v482_v38  ;;  %v487_v42 = vmul.f32 %v645_v60, %v483_v39 }
 0x166   :  { %v446_v52 = vmul.f32 %v647_v24, %v442_v26  ;;  %v447_v7 = vmul.f32 %v647_v24, %v443_v30  ;;  %v484_v10 = vmul.f32 %v647_v24, %v480_v31  ;;  %v485_v53 = vmul.f32 %v647_v24, %v481_v5 }
 0x167   :  { %vm452_vm0 = vcmp.ge.f32.partialorder %v448_v62, 0.0  ;;  %vm453_vm1 = vcmp.ge.f32.partialorder %v449_v0, 0.0  ;;  %v456_v8 = vmul.f32 0.2, %v448_v62  ;;  %v457_v1 = vmul.f32 0.2, %v449_v0 }
 0x168   :  { %vm450_vm2 = vcmp.ge.f32.partialorder %v446_v52, 0.0  ;;  %vm451_vm3 = vcmp.ge.f32.partialorder %v447_v7, 0.0  ;;  %v454_v9 = vmul.f32 0.2, %v446_v52  ;;  %v455_v16 = vmul.f32 0.2, %v447_v7 }
 0x169   :  { %v460_v11 = vsel %vm452_vm0, %v448_v62, %v456_v8  ;;  %v461_v33 = vsel %vm453_vm1, %v449_v0, %v457_v1  ;;  %vm488_vm4 = vcmp.ge.f32.partialorder %v484_v10, 0.0  ;;  %vm489_vm5 = vcmp.ge.f32.partialorder %v485_v53, 0.0 }
 0x16a   :  { %v458_v17 = vsel %vm450_vm2, %v446_v52, %v454_v9  ;;  %v459_v36 = vsel %vm451_vm3, %v447_v7, %v455_v16  ;;  %v619_v50 = vpack.c.bf16 %v461_v33, %v460_v11  ;;  %vm490_vm6 = vcmp.ge.f32.partialorder %v486_v6, 0.0 }
 0x16b   :  { %v618_v51 = vpack.c.bf16 %v459_v36, %v458_v17  ;;  %vm491_vm7 = vcmp.ge.f32.partialorder %v487_v42, 0.0  ;;  %v492_v54 = vmul.f32 0.2, %v484_v10  ;;  %v493_v55 = vmul.f32 0.2, %v485_v53 }
 0x16c   :  { %479 = vst [vmem:[#allocation2 + $0x20] sm:$0xff] %v619_v50  ;;  %v494_v58 = vmul.f32 0.2, %v486_v6  ;;  %v495_v2 = vmul.f32 0.2, %v487_v42  ;;  %v522_v3 = vmul.f32 %v647_v24, %v518_v43  ;;  %v523_v4 = vmul.f32 %v647_v24, %v519_v63 }
 0x16d   :  { %478 = vst [vmem:[#allocation2] sm:$0xff] %v618_v51  ;;  %v496_v12 = vsel %vm488_vm4, %v484_v10, %v492_v54  ;;  %v497_v13 = vsel %vm489_vm5, %v485_v53, %v493_v55  ;;  %v524_v19 = vmul.f32 %v645_v60, %v520_v56  ;;  %v525_v46 = vmul.f32 %v645_v60, %v521_v57 }
 0x16e   :  { %v498_v47 = vsel %vm490_vm6, %v486_v6, %v494_v58  ;;  %v499_v48 = vsel %vm491_vm7, %v487_v42, %v495_v2  ;;  %v620_v20 = vpack.c.bf16 %v497_v13, %v496_v12  ;;  %vm526_vm8 = vcmp.ge.f32.partialorder %v522_v3, 0.0 }
 0x16f   :  { %v621_v21 = vpack.c.bf16 %v499_v48, %v498_v47  ;;  %vm527_vm9 = vcmp.ge.f32.partialorder %v523_v4, 0.0  ;;  %vm528_vm10 = vcmp.ge.f32.partialorder %v524_v19, 0.0  ;;  %vm529_vm11 = vcmp.ge.f32.partialorder %v525_v46, 0.0 }
 0x170   :  { %516 = vst [vmem:[#allocation2 + $0x8] sm:$0xff] %v620_v20  ;;  %v530_v49 = vmul.f32 0.2, %v522_v3  ;;  %v531_v40 = vmul.f32 0.2, %v523_v4  ;;  %v560_v27 = vmul.f32 %v647_v24, %v556_v61  ;;  %v561_v44 = vmul.f32 %v647_v24, %v557_v22 }
 0x171   :  { %v532_v29 = vmul.f32 0.2, %v524_v19  ;;  %517 = vst [vmem:[#allocation2 + $0x28] sm:$0xff] %v621_v21  ;;  %v533_v41 = vmul.f32 0.2, %v525_v46  ;;  %v562_v45 = vmul.f32 %v645_v60, %v558_v59  ;;  %v563_v23 = vmul.f32 %v645_v60, %v559_v25 }
 0x172   :  { %v534_v28 = vsel %vm526_vm8, %v522_v3, %v530_v49  ;;  %v535_v32 = vsel %vm527_vm9, %v523_v4, %v531_v40  ;;  %vm564_vm12 = vcmp.ge.f32.partialorder %v560_v27, 0.0  ;;  %vm565_vm13 = vcmp.ge.f32.partialorder %v561_v44, 0.0 }
 0x173   :  { %v536_v34 = vsel %vm528_vm10, %v524_v19, %v532_v29  ;;  %v537_v35 = vsel %vm529_vm11, %v525_v46, %v533_v41  ;;  %v622_v37 = vpack.c.bf16 %v535_v32, %v534_v28  ;;  %vm566_vm14 = vcmp.ge.f32.partialorder %v562_v45, 0.0 }
 0x174   :  { %v623_v38 = vpack.c.bf16 %v537_v35, %v536_v34  ;;  %vm567_vm15 = vcmp.ge.f32.partialorder %v563_v23, 0.0  ;;  %v568_v39 = vmul.f32 0.2, %v560_v27  ;;  %v569_v56 = vmul.f32 0.2, %v561_v44 }
 0x175   :  { %554 = vst [vmem:[#allocation2 + $0x10] sm:$0xff] %v622_v37  ;;  %v570_v14 = vmul.f32 0.2, %v562_v45  ;;  %v571_v57 = vmul.f32 0.2, %v563_v23 }
 0x176   :  { %555 = vst [vmem:[#allocation2 + $0x30] sm:$0xff] %v623_v38  ;;  %v572_v15 = vsel %vm564_vm12, %v560_v27, %v568_v39  ;;  %v573_v18 = vsel %vm565_vm13, %v561_v44, %v569_v56 }
 0x177   :  { %v574_v59 = vsel %vm566_vm14, %v562_v45, %v570_v14  ;;  %v575_v25 = vsel %vm567_vm15, %v563_v23, %v571_v57  ;;  %v624_v26 = vpack.c.bf16 %v573_v18, %v572_v15 }
 0x178   :  { %v625_v30 = vpack.c.bf16 %v575_v25, %v574_v59 }
 0x179   :  { %592 = vst [vmem:[#allocation2 + $0x18] sm:$0xff] %v624_v26 }
 0x17a   :  { %593 = vst [vmem:[#allocation2 + $0x38] sm:$0xff] %v625_v30 }
 0x17b   :  { %659 = shalt.err (!%p656_p4)
}
 0x17c   :  { %s660_s28 = scalar_lea.hbm %s962_s2, 1024 }
 0x17d   :  { %p661_p5 = scmp.ne.s32.totalorder %s962_s2, %s660_s28  ;;  %p664_p6 = scmp.lt.u32.totalorder %s660_s28, %s962_s2 }
 0x17f   :  { %p666_p7 = pnand %p664_p6, %p661_p5 }
 0x181   :  { %669 = shalt.err (!%p666_p7)
}
 0x182   :  { %s677_s5 = smov 128   ;;  %s678_s6 = smov 8  }
 0x183   :  { %605 = dma.vmem_to_hbm [thread:$0]  %s600_s24, 1024, %s962_s2, [#allocation3], %s677_s5, %s677_s5, %s678_s6  }
 0x184   :  { %670 = dma.done.wait [#allocation3], 1024  }
 0x185   :  { %671 = vsyncadd [#allocation3], 4294966272 }
 0x186   :  { %609 = vsyncpa [#allocation3], 1 }

</bundles_post_ra>
